<compile_context>
chip_gen: v7x
topology: tpu7x:2x2x1
jax: 0.10.0
libtpu: 0.0.40
codegen_flags: <defaults>
</compile_context>

<pallas_src>
import jax
import jax.numpy as jnp
from jax.experimental import pallas as pl
from jax.experimental.pallas import tpu as pltpu

IN_F = 5
IN_PAD = 8          # fc1 contraction dim padded to a sublane multiple for the MXU
HID = 256
OUT = 256
BN_EPS = 1e-5


def _round_up(n, m):
    return ((n + m - 1) // m) * m


def encoder_box_kernel(x_ref, w1_ref, b1_ref, w2_ref, b2_ref, o_ref):
    # fc1 (BN + b1 pre-folded) on the MXU: bf16 inputs, f32 accumulation.
    x = x_ref[...].astype(jnp.bfloat16)                              # (TB, IN_PAD)
    h = jnp.dot(x, w1_ref[...], preferred_element_type=jnp.float32)  # (TB, HID) f32
    h = h + b1_ref[...]

    # ReLU; Dropout(0.2) is the identity in eval mode.
    h = jnp.maximum(h, 0.0)

    # fc2 on the MXU: (TB,256)x(256,256) bf16 with f32 accumulation.
    acc = jnp.dot(h.astype(jnp.bfloat16), w2_ref[...],
                  preferred_element_type=jnp.float32)
    o_ref[...] = (acc + b2_ref[...]).astype(o_ref.dtype)


def encoder_box_forward(x, params, *, block_b=2048, out_dtype=jnp.float32):
    """x: [B, IN_F] f32.  params: folded (w1f8_bf16, b1f, w2_bf16, b2)."""
    w1f8, b1f, w2_bf16, b2 = params
    B = x.shape[0]

    # Pad the contraction dim 5 -> 8 (zero columns) so fc1 maps onto the MXU.
    x8 = jnp.pad(x, ((0, 0), (0, IN_PAD - IN_F)))

    # Pad the batch only to a sublane multiple (8); the grid may end with a
    # partial tile (stores stay lane-dense since OUT=256, only sublane-masked).
    B_pad = _round_up(max(B, 8), 8)
    if B_pad != B:
        x8 = jnp.pad(x8, ((0, B_pad - B), (0, 0)))

    # Batch tile: as large as block_b allows (amortizes per-step overhead), but
    # keep grid >= 2 when the batch permits so v7x's second TensorCore works.
    TB = min(block_b, B_pad)
    if TB == B_pad and B_pad >= 16:
        TB = _round_up(pl.cdiv(B_pad, 2), 8)
    grid = (pl.cdiv(B_pad, TB),)

    out = pl.pallas_call(
        encoder_box_kernel,
        out_shape=jax.ShapeDtypeStruct((B_pad, OUT), out_dtype),
        grid=grid,
        in_specs=[
            pl.BlockSpec((TB, IN_PAD), lambda i: (i, 0)),   # x: tiled over batch
            pl.BlockSpec((IN_PAD, HID), lambda i: (0, 0)),  # w1 (folded, bf16): resident
            pl.BlockSpec((1, HID), lambda i: (0, 0)),       # b1 (folded): resident
            pl.BlockSpec((HID, OUT), lambda i: (0, 0)),     # w2 (bf16): resident
            pl.BlockSpec((1, OUT), lambda i: (0, 0)),       # b2: resident
        ],
        out_specs=pl.BlockSpec((TB, OUT), lambda i: (i, 0)),
        compiler_params=pltpu.CompilerParams(
            dimension_semantics=("parallel",)),
    )(x8, w1f8, b1f, w2_bf16, b2)
    return out[:B]


def init_params(key):
    """Raw PyTorch-style parameters (nn.Linear defaults, BN defaults)."""
    k1, k2, k3, k4 = jax.random.split(key, 4)
    lim1 = 1.0 / jnp.sqrt(IN_F)
    lim2 = 1.0 / jnp.sqrt(HID)
    w1 = jax.random.uniform(k1, (IN_F, HID), jnp.float32, -lim1, lim1)
    b1 = jax.random.uniform(k2, (1, HID), jnp.float32, -lim1, lim1)
    w2 = jax.random.uniform(k3, (HID, OUT), jnp.float32, -lim2, lim2)
    b2 = jax.random.uniform(k4, (1, OUT), jnp.float32, -lim2, lim2)
    gamma = jnp.ones((1, HID), jnp.float32)
    beta = jnp.zeros((1, HID), jnp.float32)
    running_mean = jnp.zeros((1, HID), jnp.float32)
    running_var = jnp.ones((1, HID), jnp.float32)
    return w1, b1, gamma, beta, running_mean, running_var, w2, b2


def fold_params(raw):
    """One-time host-side transform: fold eval-mode BN + b1 into fc1,
    pad fc1's contraction dim 5 -> 8, cast MXU operands to bf16."""
    w1, b1, gamma, beta, mean, var, w2, b2 = raw
    scale = gamma / jnp.sqrt(var + BN_EPS)       # (1, HID)
    shift = beta - mean * scale                  # (1, HID)
    w1f = w1 * scale                             # broadcast over columns
    b1f = b1 * scale + shift
    w1f8 = jnp.pad(w1f, ((0, IN_PAD - IN_F), (0, 0))).astype(jnp.bfloat16)
    return w1f8, b1f, w2.astype(jnp.bfloat16), b2


def reference_forward(x, raw):
    """Pure-JAX f32 eval-mode reference of the PyTorch module."""
    w1, b1, gamma, beta, mean, var, w2, b2 = raw
    h = x @ w1 + b1
    h = (h - mean) * (gamma / jnp.sqrt(var + BN_EPS)) + beta
    h = jnp.maximum(h, 0.0)          # dropout = identity in eval mode
    return h @ w2 + b2


if __name__ == "__main__":
    key = jax.random.PRNGKey(0)
    kx, kp = jax.random.split(key)
    B = 10                                       # not a multiple of 8: exercises padding
    x = jax.random.normal(kx, (B, IN_F), jnp.float32)

    raw = init_params(kp)
    params = fold_params(raw)

    out = jax.block_until_ready(encoder_box_forward(x, params))
    ref = reference_forward(x, raw)

    assert out.shape == (B, OUT)
    # bf16 MXU inputs (f32 accumulation) -> small rounding vs the f32 reference.
    assert jnp.allclose(out, ref, atol=3e-2, rtol=3e-2)
    print("KERNEL_OK")
</pallas_src>

<mosaic_0001>
module attributes {stable_mosaic.version = 11 : i64} {
  func.func @encoder_box_kernel(%arg0: i32, %arg1: memref<8x8xf32, #tpu.memory_space<vmem>>, %arg2: memref<8x256xbf16, #tpu.memory_space<vmem>>, %arg3: memref<1x256xf32, #tpu.memory_space<vmem>>, %arg4: memref<256x256xbf16, #tpu.memory_space<vmem>>, %arg5: memref<1x256xf32, #tpu.memory_space<vmem>>, %arg6: memref<8x256xf32, #tpu.memory_space<vmem>>) attributes {dimension_semantics = [#tpu.dimension_semantics<parallel>], iteration_bounds = array<i64: 2>, scalar_prefetch = 0 : i64, scratch_operands = 0 : i64, tpu.core_type = #tpu.core_type<tc>, window_params = [{transform_indices = @transform_0, window_bounds = array<i64: 8, 8>}, {pipeline_mode = #tpu.pipeline_mode<synchronous>, transform_indices = @transform_1, window_bounds = array<i64: 8, 256>}, {pipeline_mode = #tpu.pipeline_mode<synchronous>, transform_indices = @transform_2, window_bounds = array<i64: 1, 256>}, {pipeline_mode = #tpu.pipeline_mode<synchronous>, transform_indices = @transform_3, window_bounds = array<i64: 256, 256>}, {pipeline_mode = #tpu.pipeline_mode<synchronous>, transform_indices = @transform_4, window_bounds = array<i64: 1, 256>}, {transform_indices = @transform_5, window_bounds = array<i64: 8, 256>}]} {
    %c0 = arith.constant 0 : index
    %c0_0 = arith.constant 0 : index
    %0 = vector.load %arg1[%c0, %c0_0] : memref<8x8xf32, #tpu.memory_space<vmem>>, vector<8x8xf32>
    %1 = arith.truncf %0 : vector<8x8xf32> to vector<8x8xbf16>
    %c0_1 = arith.constant 0 : index
    %c0_2 = arith.constant 0 : index
    %2 = vector.load %arg2[%c0_1, %c0_2] : memref<8x256xbf16, #tpu.memory_space<vmem>>, vector<8x256xbf16>
    %cst = arith.constant dense<0.000000e+00> : vector<8x256xf32>
    %3 = tpu.matmul %1, %2, %cst {dimension_numbers = #tpu.dot_dimension_numbers<[1], [0], [0], [1], [0, 0, 1, 1], [], []>} : vector<8x8xbf16>, vector<8x256xbf16>, vector<8x256xf32> -> vector<8x256xf32>
    %c0_3 = arith.constant 0 : index
    %c0_4 = arith.constant 0 : index
    %4 = vector.load %arg3[%c0_3, %c0_4] : memref<1x256xf32, #tpu.memory_space<vmem>>, vector<1x256xf32>
    %5 = vector.broadcast %4 : vector<1x256xf32> to vector<8x256xf32>
    %6 = arith.addf %3, %5 : vector<8x256xf32>
    %cst_5 = arith.constant 0.000000e+00 : f32
    %7 = vector.broadcast %cst_5 : f32 to vector<8x256xf32>
    %8 = arith.maximumf %6, %7 : vector<8x256xf32>
    %9 = arith.truncf %8 : vector<8x256xf32> to vector<8x256xbf16>
    %c0_6 = arith.constant 0 : index
    %c0_7 = arith.constant 0 : index
    %10 = vector.load %arg4[%c0_6, %c0_7] : memref<256x256xbf16, #tpu.memory_space<vmem>>, vector<256x256xbf16>
    %cst_8 = arith.constant dense<0.000000e+00> : vector<8x256xf32>
    %11 = tpu.matmul %9, %10, %cst_8 {dimension_numbers = #tpu.dot_dimension_numbers<[1], [0], [0], [1], [0, 0, 1, 1], [], []>} : vector<8x256xbf16>, vector<256x256xbf16>, vector<8x256xf32> -> vector<8x256xf32>
    %c0_9 = arith.constant 0 : index
    %c0_10 = arith.constant 0 : index
    %12 = vector.load %arg5[%c0_9, %c0_10] : memref<1x256xf32, #tpu.memory_space<vmem>>, vector<1x256xf32>
    %13 = vector.broadcast %12 : vector<1x256xf32> to vector<8x256xf32>
    %14 = arith.addf %11, %13 : vector<8x256xf32>
    %c0_11 = arith.constant 0 : index
    %c0_12 = arith.constant 0 : index
    %15 = vector.load %arg6[%c0_11, %c0_12] : memref<8x256xf32, #tpu.memory_space<vmem>>, vector<8x256xf32>
    tpu.vector_store %arg6[%c0_11, %c0_12], %14 {strides = array<i32>} : memref<8x256xf32, #tpu.memory_space<vmem>>, vector<8x256xf32>,
    return
  }
  func.func @transform_0(%arg0: i32) -> (i32, i32) {
    %c0_i32 = arith.constant 0 : i32
    %c0_i32_0 = arith.constant 0 : i32
    return %arg0, %c0_i32 : i32, i32
  }
  func.func @transform_1(%arg0: i32) -> (i32, i32) {
    %c0_i32 = arith.constant 0 : i32
    %c0_i32_0 = arith.constant 0 : i32
    %c0_i32_1 = arith.constant 0 : i32
    return %c0_i32, %c0_i32_0 : i32, i32
  }
  func.func @transform_2(%arg0: i32) -> (i32, i32) {
    %c0_i32 = arith.constant 0 : i32
    %c0_i32_0 = arith.constant 0 : i32
    %c0_i32_1 = arith.constant 0 : i32
    return %c0_i32, %c0_i32_0 : i32, i32
  }
  func.func @transform_3(%arg0: i32) -> (i32, i32) {
    %c0_i32 = arith.constant 0 : i32
    %c0_i32_0 = arith.constant 0 : i32
    %c0_i32_1 = arith.constant 0 : i32
    return %c0_i32, %c0_i32_0 : i32, i32
  }
  func.func @transform_4(%arg0: i32) -> (i32, i32) {
    %c0_i32 = arith.constant 0 : i32
    %c0_i32_0 = arith.constant 0 : i32
    %c0_i32_1 = arith.constant 0 : i32
    return %c0_i32, %c0_i32_0 : i32, i32
  }
  func.func @transform_5(%arg0: i32) -> (i32, i32) {
    %c0_i32 = arith.constant 0 : i32
    %c0_i32_0 = arith.constant 0 : i32
    return %arg0, %c0_i32 : i32, i32
  }
}

</mosaic_0001>

<bundles_post_ra>
// kernel: tpu_custom_call.1
= control target key start
LH: loop header
LB: loop body
LE: loop exit
PB: predicated region body
PF: predicated region fallthrough
CT: control target
= control target key end

     0   :  { %10 = vsyncpa [#allocation3], 0  ;;  %s1073_s0 = inlined_call_operand.vmem [shape: f32[16,8], index: 0, kind: input, shape index: {}]   ;;  %s1074_s1 = inlined_call_operand.vmem [shape: bf16[8,256], index: 1, kind: input, shape index: {}]   ;;  %s1075_s2 = inlined_call_operand.vmem [shape: f32[1,256], index: 2, kind: input, shape index: {}]   ;;  %s1076_s3 = inlined_call_operand.hbm [shape: bf16[256,256], index: 3, kind: input, shape index: {}]   ;;  %s1077_s4 = inlined_call_operand.vmem [shape: f32[1,256], index: 4, kind: input, shape index: {}]   ;;  %s1078_s5 = inlined_call_operand.hbm [shape: f32[16,256], index: 5, kind: output, shape index: {}]  }
   0x1   :  { %11 = vsyncpa [#allocation4], 0 }
   0x2   :  { %13 = vsyncpa [#allocation4 + $0x1], 0  ;;  %s929_s18 = smov 0   ;;  %s931_s19 = smov 0  }
   0x3   :  { %s933_s20 = smov 0   ;;  %s935_s21 = smov 0  }
   0x4 LB: > { %s950_s22 = sadd.s32 4294967295, %s892_s21   ;;  %s645_s23 = sadd.s32 4294967294, %s892_s21   ;;  %s892_s21 = sphi %s935_s21, %s1094_s21   ;;  %s888_s20 = sphi %s933_s20, %s1093_s20   ;;  %s884_s19 = sphi %s931_s19, %s1092_s19   ;;  %s880_s18 = sphi %s929_s18, %s1091_s18  }
   0x5   : > { %s954_s24 = sadd.s32 1, %s892_s21   ;;  %s136_s25 = sadd.s32 1, %s888_s20 }
   0x6   : > { %s133_s26 = ssub.s32 %s892_s21, %s954_s24  ;;  %p146_p0 = scmp.ne.s32.totalorder %s888_s20, %s884_s19 }
   0x7   : > { %p134_p1 = scmp.eq.s32.totalorder %s133_s26, 0  ;;  %p147_p2 = scmp.eq.s32.totalorder %s950_s22, 1 }
   0x8   : > { %p152_p3 = scmp.ne.s32.totalorder %s884_s19, %s880_s18  ;;  %p153_p4 = scmp.eq.s32.totalorder %s645_s23, 1 }
   0x9   : > { %s965_s27 = scalar_select %p134_p1, %s888_s20, %s136_s25  }
   0xa   : > { %p967_p5 = por %p147_p2, %p146_p0  ;;  %p971_p6 = por %p153_p4, %p152_p3 }
   0xb   : > { %p646_p7 = scmp.ge.s32.totalorder %s892_s21, 1  ;;  %p160_p8 = scmp.lt.s32.totalorder %s892_s21, 3 }
   0xc   : > { %s1082_s28 = scalar_select %p967_p5, 1, 0 }
   0xd   : > { %s1083_s29 = scalar_select %p971_p6, 1, 0 }
   0xe   : > { %p1079_p9 = scmp.eq.s32.totalorder %s950_s22, 0  ;;  %p978_p10 = pnand %p646_p7, %p160_p8 }
   0xf   : > { %s894_s6 = smov [#allocation2]   ;;  %s798_s11 = scalar_lea.hbm %s1076_s3, 4096 }
  0x10   : > { %s1084_s30 = scalar_select %p978_p10, 1, 0 }
  0x11   : > { %s178_s7 = sshll.u32 %s894_s6, 4  ;;  %p701_p11 = pneg %p978_p10  ;;  %s179_s7 = int_to_ptr.vmem [resolvable:$true] %s178_s7 }
  0x12   : > { %p799_p13 = scmp.ne.s32.totalorder %s1076_s3, %s798_s11  ;;  %p805_p3 = scmp.lt.u32.totalorder %s798_s11, %s1076_s3 }
  0x13   : > { %p986_p12 = pnand %p1079_p9, %p701_p11 }
  0x15   : > { %p800_p0 = pneg %p986_p12 }
  0x17   : > { %p801_p1 = pnand %p800_p0, %p799_p13 }
  0x19   : > { %p802_p2 = pneg %p801_p1 }
  0x1b   : > { %p807_p4 = pnand %p805_p3, %p802_p2 }
  0x1d   : > { %810 = shalt.err (!%p807_p4)
}
  0x1e   : > { %s811_s16 = scalar_lea.vmem %s179_s7, 4096  ;;  %p819_p9 = scmp.lt.s32.totalorder %s179_s7, %s179_s7 }
  0x1f   : > { %p812_p7 = scmp.ne.s32.totalorder %s179_s7, %s811_s16  ;;  %p820_p6 = scmp.lt.s32.totalorder %s811_s16, %s811_s16 }
  0x21   : > { %p814_p8 = pnand %p812_p7, %p800_p0  ;;  %p821_p5 = por %p820_p6, %p819_p9 }
  0x23   : > { %p815_p11 = pneg %p814_p8 }
  0x25   : > { %p822_p10 = pnand %p821_p5, %p815_p11 }
  0x27   : > { %825 = shalt.err (!%p822_p10)
}
  0x28   : > { %s895_s17 = smov 128   ;;  %s896_s23 = smov 8  }
  0x29   : > { %704 = dma.hbm_to_vmem [thread:$0]  (!%p986_p12), %s1076_s3, 4096, %s179_s7, [#allocation3], %s895_s17, %s895_s17, %s896_s23  }
  0x2a   : > { %p1086_p13 = scmp.ne.s32.totalorder %s1084_s30, 0 }
  0x2b   : > { %p1087_p1 = scmp.eq.s32.totalorder (!%p1086_p13), %s950_s22, 0 }
  0x2c   : > { %204 = sbr.rel (%p1086_p13) target bundleno = 510 (0x1fe), region = 40 }
  0x33   : > { %871 = dma.done.wait (%p1087_p1), [#allocation3], 4096   ;;  %p1088_p0 = pmov %p1087_p1 }
  0x34   : > { %p231_p5 = scmp.lt.s32.totalorder %s950_s22, 1  ;;  %v897_v0 = vmov 0   ;;  %v238_v1 = vld [vmem:[%s1074_s1] sm:$0xff]  ;;  %vm260_vm0 = vcmask 1043456   ;;  %v753_v7 = vld [vmem:[#allocation2 + $0x14] ss:$8 sps:$4 sm:$0xff]   ;;  %v241_v39 = vlaneseq }
  0x35   : > { %873 = vsyncadd (%p1088_p0), [#allocation3], 4294963200  ;;  %299 = vmatprep.mubr.bf16.mxu0 %v897_v0  ;;  %v654_v3 = vcombine.high %v238_v1, %v238_v1  ;;  %v653_v4 = vcombine.low %v238_v1, %v238_v1  ;;  %v750_v5 = vld [vmem:[#allocation2 + $0x4] ss:$8 sps:$4 sm:$0xff]   ;;  %v752_v6 = vld [vmem:[#allocation2] ss:$8 sps:$4 sm:$0xff]  }
  0x36   : > { %s232_s6 = scalar_select %p231_p5, %s950_s22, 1  ;;  %516 = vmatprep.subr.bf16.mxu1 %v750_v5  ;;  %vm256_vm1 = vcmask 64512   ;;  %v755_v10 = vld [vmem:[#allocation2 + $0x10] ss:$8 sps:$4 sm:$0xff]   ;;  %v756_v11 = vld [vmem:[#allocation2 + $0x24] ss:$8 sps:$4 sm:$0xff]  }
  0x37   : > { %655 = vmatprep.subr.msk.bf16.mxu0 %vm260_vm0, %v654_v3  ;;  %v262_v8 = vsel %vm260_vm0, %v653_v4, 0  ;;  %517 = vmatpush1.bf16.msra.mxu1 %v752_v6  ;;  %v758_v12 = vld [vmem:[#allocation2 + $0x20] ss:$8 sps:$4 sm:$0xff]   ;;  %v759_v13 = vld [vmem:[#allocation2 + $0x34] ss:$8 sps:$4 sm:$0xff]   ;;  %v242_v40 = vshrl.u32 %v241_v39, 7 }
  0x38   : > { %s652_s8 = sshll.u32 %s232_s6, 3  ;;  %268 = vmatpush1.bf16.msra.mxu0 %v262_v8  ;;  %518 = vmatprep.subr.bf16.mxu1 %v753_v7  ;;  %v761_v14 = vld [vmem:[#allocation2 + $0x30] ss:$8 sps:$4 sm:$0xff]   ;;  %v762_v15 = vld [vmem:[#allocation2 + $0x44] ss:$8 sps:$4 sm:$0xff]   ;;  %s228_s14 = sand.u32 1, %s884_s19  }
  0x39   : > { %s234_s7 = scalar_lea.vmem %s1073_s0, %s652_s8  ;;  %v764_v16 = vld [vmem:[#allocation2 + $0x40] ss:$8 sps:$4 sm:$0xff]   ;;  %v765_v17 = vld [vmem:[#allocation2 + $0x54] ss:$8 sps:$4 sm:$0xff]   ;;  %v767_v18 = vld [vmem:[#allocation2 + $0x50] ss:$8 sps:$4 sm:$0xff]  }
  0x3a   : > { %v236_v2 = vld [vmem:[%s234_s7] sm:$0xff]  ;;  %v771_v21 = vld [vmem:[#allocation2 + $0x74] ss:$8 sps:$4 sm:$0xff]   ;;  %v773_v22 = vld [vmem:[#allocation2 + $0x70] ss:$8 sps:$4 sm:$0xff]   ;;  %v243_v41 = vsub.s32 0, %v242_v40 }
  0x3b   : > { %v237_v9 = vpack.c.bf16 %v236_v2, %v236_v2  ;;  %519 = vmatpush1.bf16.msra.mxu1 %v755_v10  ;;  %v768_v19 = vld [vmem:[#allocation2 + $0x64] ss:$8 sps:$4 sm:$0xff]   ;;  %v770_v20 = vld [vmem:[#allocation2 + $0x60] ss:$8 sps:$4 sm:$0xff]   ;;  %v777_v25 = vld [vmem:[#allocation2 + $0x94] ss:$8 sps:$4 sm:$0xff]  }
  0x3c   : > { %520 = vmatprep.subr.bf16.mxu1 %v756_v11  ;;  %v774_v23 = vld [vmem:[#allocation2 + $0x84] ss:$8 sps:$4 sm:$0xff]   ;;  %v776_v24 = vld [vmem:[#allocation2 + $0x80] ss:$8 sps:$4 sm:$0xff]   ;;  %v779_v26 = vld [vmem:[#allocation2 + $0x90] ss:$8 sps:$4 sm:$0xff]  }
  0x3d   : > { %656 = vmatmul.mubr.msk.bf16.vlgmr.msra.gmra.mrb[0].mxu0 %vm256_vm1, %v237_v9  ;;  %v780_v27 = vld [vmem:[#allocation2 + $0xa4] ss:$8 sps:$4 sm:$0xff]   ;;  %v782_v28 = vld [vmem:[#allocation2 + $0xa0] ss:$8 sps:$4 sm:$0xff]   ;;  %v783_v29 = vld [vmem:[#allocation2 + $0xb4] ss:$8 sps:$4 sm:$0xff]  }
  0x3e   : > { %v785_v30 = vld [vmem:[#allocation2 + $0xb0] ss:$8 sps:$4 sm:$0xff]   ;;  %v786_v31 = vld [vmem:[#allocation2 + $0xc4] ss:$8 sps:$4 sm:$0xff]   ;;  %v788_v32 = vld [vmem:[#allocation2 + $0xc0] ss:$8 sps:$4 sm:$0xff]  }
  0x3f   : > { %521 = vmatpush1.bf16.msra.mxu1 %v758_v12  ;;  %v789_v33 = vld [vmem:[#allocation2 + $0xd4] ss:$8 sps:$4 sm:$0xff]   ;;  %v791_v34 = vld [vmem:[#allocation2 + $0xd0] ss:$8 sps:$4 sm:$0xff]   ;;  %v792_v35 = vld [vmem:[#allocation2 + $0xe4] ss:$8 sps:$4 sm:$0xff]  }
  0x40   : > { %522 = vmatprep.subr.bf16.mxu1 %v759_v13  ;;  %v794_v36 = vld [vmem:[#allocation2 + $0xe0] ss:$8 sps:$4 sm:$0xff]   ;;  %v795_v37 = vld [vmem:[#allocation2 + $0xf4] ss:$8 sps:$4 sm:$0xff]   ;;  %v797_v38 = vld [vmem:[#allocation2 + $0xf0] ss:$8 sps:$4 sm:$0xff]  }
  0x41   : > { %v239_v42 = vld [vmem:[%s1075_s2] sm:$0x3]  ;;  %v247_v43 = vsub.s32 1, %v242_v40  ;;  %s651_s15 = sshll.u32 %s228_s14, 4  ;;  %s694_s23 = sshll.u32 %s950_s22, 8 }
  0x42   : > { %v244_v44 = vrot.slane %v239_v42, %v243_v41  ;;  %v344_v56 = vld [vmem:[%s1077_s4] sm:$0x3]  ;;  %s230_s25 = scalar_lea.vmem [#allocation5], %s651_s15  ;;  %s1031_s9 = scalar_lea.hbm %s1078_s5, %s694_s23 }
  0x43   : > { %523 = vmatpush1.bf16.msra.mxu1 %v761_v14  ;;  %v248_v45 = vrot.slane %v239_v42, %v247_v43  ;;  %v349_v57 = vrot.slane %v344_v56, %v243_v41  ;;  %v353_v58 = vrot.slane %v344_v56, %v247_v43  ;;  %s574_s26 = sshll.u32 %s230_s25, 4  ;;  %s560_s22 = scalar_lea.sflag [#allocation4], %s228_s14  ;;  %s1033_s26 = int_to_ptr.vmem [resolvable:$true] %s574_s26 }
  0x44   : > { %524 = vmatprep.subr.bf16.mxu1 %v762_v15  ;;  %s826_s10 = scalar_lea.vmem %s1033_s26, 256  ;;  %p1089_p9 = scmp.ne.s32.totalorder %s1082_s28, 0 }
  0x45   : > { %p827_p6 = scmp.ne.s32.totalorder %s1033_s26, %s826_s10  ;;  %s898_s7 = smov [#allocation5]  }
  0x46   : > { %s830_s11 = sshll.u32 %s898_s7, 4  ;;  %s831_s11 = int_to_ptr.vmem [resolvable:$false] %s830_s11 }
  0x47   : > { %525 = vmatpush1.bf16.msra.mxu1 %v764_v16  ;;  %p828_p10 = pnand %p827_p6, %p1089_p9  ;;  %s832_s30 = scalar_lea.vmem %s831_s11, 512 }
  0x48   : > { %526 = vmatprep.subr.bf16.mxu1 %v765_v17  ;;  %p833_p2 = scmp.lt.s32.totalorder %s1033_s26, %s831_s11  ;;  %p834_p3 = scmp.lt.s32.totalorder %s832_s30, %s826_s10 }
  0x49   : > { %p829_p12 = pneg %p828_p10 }
  0x4a   : > { %p835_p4 = por %p834_p3, %p833_p2 }
  0x4b   : > { %527 = vmatpush1.bf16.msra.mxu1 %v767_v18 }
  0x4c   : > { %528 = vmatprep.subr.bf16.mxu1 %v768_v19  ;;  %p836_p7 = pnand %p835_p4, %p829_p12 }
  0x4f   : > { %529 = vmatpush1.bf16.msra.mxu1 %v770_v20 }
  0x50   : > { %530 = vmatprep.subr.bf16.mxu1 %v771_v21 }
  0x53   : > { %531 = vmatpush1.bf16.msra.mxu1 %v773_v22 }
  0x54   : > { %532 = vmatprep.subr.bf16.mxu1 %v774_v23 }
  0x57   : > { %533 = vmatpush1.bf16.msra.mxu1 %v776_v24 }
  0x58   : > { %534 = vmatprep.subr.bf16.mxu1 %v777_v25 }
  0x5b   : > { %535 = vmatpush1.bf16.msra.mxu1 %v779_v26 }
  0x5c   : > { %536 = vmatprep.subr.bf16.mxu1 %v780_v27 }
  0x5f   : > { %537 = vmatpush1.bf16.msra.mxu1 %v782_v28 }
  0x60   : > { %538 = vmatprep.subr.bf16.mxu1 %v783_v29 }
  0x63   : > { %539 = vmatpush1.bf16.msra.mxu1 %v785_v30 }
  0x64   : > { %540 = vmatprep.subr.bf16.mxu1 %v786_v31 }
  0x67   : > { %541 = vmatpush1.bf16.msra.mxu1 %v788_v32 }
  0x68   : > { %542 = vmatprep.subr.bf16.mxu1 %v789_v33 }
  0x6b   : > { %543 = vmatpush1.bf16.msra.mxu1 %v791_v34 }
  0x6c   : > { %544 = vmatprep.subr.bf16.mxu1 %v792_v35 }
  0x6f   : > { %545 = vmatpush1.bf16.msra.mxu1 %v794_v36 }
  0x70   : > { %546 = vmatprep.subr.bf16.mxu1 %v795_v37 }
  0x73   : > { %547 = vmatpush1.bf16.msra.mxu1 %v797_v38 }
 0x110   : > { %v301_v46 = vpop.f32.mrb[0].mxu0 }
 0x111   : > { %v302_v47 = vadd.f32 %v301_v46, %v244_v44  ;;  %v303_v48 = vpop.f32.mrb[1].mxu0 }
 0x112   : > { %v304_v49 = vadd.f32 %v303_v48, %v248_v45  ;;  %v305_v50 = vpop.f32.mrb[2].mxu0 }
 0x113   : > { %v308_v51 = vmax.f32 %v302_v47, 0.0  ;;  %v306_v52 = vpop.f32.mrb[3].mxu0 }
 0x114   : > { %v309_v53 = vmax.f32 %v304_v49, 0.0 }
 0x115   : > { %v310_v55 = vpack.c.bf16 %v308_v51, %v308_v51 }
 0x116   : > { %v311_v54 = vpack.c.bf16 %v309_v53, %v309_v53 }
 0x118   : > { %548 = vmatprep.mubr.bf16.mxu1 %v311_v54 }
 0x119   : > { %549 = vmatmul.mubr.bf16.vlgmr.msra.gmra.mrb[0].mxu1 %v310_v55 }
 0x1ec   : > { %v550_v59 = vpop.f32.mrb[0].mxu1 }
 0x1ed   : > { %v551_v60 = vadd.f32 %v550_v59, %v349_v57  ;;  %v552_v61 = vpop.f32.mrb[1].mxu1 }
 0x1ee   : > { %v553_v62 = vadd.f32 %v552_v61, %v353_v58  ;;  %v554_v63 = vpop.f32.mrb[2].mxu1 }
 0x1ef   : > { %557 = vst [vmem:[%s230_s25] sm:$0xff] %v551_v60  ;;  %v555_v0 = vpop.f32.mrb[3].mxu1 }
 0x1f0   : > { %558 = vst [vmem:[%s230_s25 + $0x8] sm:$0xff] %v553_v62 }
 0x1f1   : > { %839 = shalt.err (!%p836_p7)
}
 0x1f2   : > { %s840_s12 = scalar_lea.hbm %s1031_s9, 256  ;;  %s844_s15 = scalar_lea.hbm %s1078_s5, 512 }
 0x1f3   : > { %p841_p8 = scmp.ne.s32.totalorder %s1031_s9, %s840_s12  ;;  %p845_p1 = scmp.lt.u32.totalorder %s1031_s9, %s1078_s5 }
 0x1f4   : > { %p846_p0 = scmp.lt.u32.totalorder %s844_s15, %s840_s12  ;;  %p848_p6 = scmp.lt.u32.totalorder %s840_s12, %s1031_s9 }
 0x1f5   : > { %p842_p11 = pnand %p841_p8, %p1089_p9 }
 0x1f6   : > { %p847_p5 = por %p846_p0, %p845_p1 }
 0x1f7   : > { %p843_p13 = pneg %p842_p11 }
 0x1f8   : > { %p849_p10 = por %p848_p6, %p847_p5 }
 0x1fa   : > { %p850_p12 = pnand %p849_p10, %p843_p13 }
 0x1fc   : > { %853 = shalt.err (!%p850_p12)
}
 0x1fd   : > { %699 = dma.vmem_to_hbm [thread:$0]  (%p1089_p9), %s1033_s26, 256, %s1031_s9, %s560_s22  }
 0x1fe PF: > { %p711_p2 = scmp.ge.s32.totalorder %s892_s21, 2  ;;  %s586_s23 = sand.u32 1, %s880_s18  }
 0x1ff   : > { %p1090_p3 = scmp.ne.s32.totalorder %s1083_s29, 0  ;;  %s587_s25 = scalar_lea.sflag [#allocation4], %s586_s23 }
 0x201   : > { %p706_p4 = pnand %p711_p2, %p1090_p3 }
 0x203   : > { %875 = dma.done.wait (!%p706_p4), %s587_s25, 256  }
 0x204   : > { %877 = vsyncadd (!%p706_p4), %s587_s25, 4294967040  ;;  %p16_p7 = scmp.ge.s32.totalorder %s954_s24, 4   ;;  %s1091_s18 = smov %s884_s19 }
 0x205   : > { %s1092_s19 = smov %s888_s20  ;;  %s1093_s20 = smov %s965_s27 }
 0x206   : > { %s1094_s21 = smov %s954_s24  ;;  %18 = sbr.rel (!%p16_p7) target bundleno = 4 (0x4), region = 80 }
 0x20d   :  { %592 = vsyncpa [#allocation3], 1 }
 0x20e   :  { %594 = vsyncpa [#allocation3 + $0x1], 1 }
 0x20f   :  { %595 = vsyncpa [#allocation4], 1 }
 0x210   :  { %597 = vsyncpa [#allocation4 + $0x1], 1 }

</bundles_post_ra>
